<compile_context>
chip_gen: v7x
topology: tpu7x:2x2x1
jax: 0.10.0
libtpu: 0.0.40
codegen_flags: <defaults>
</compile_context>

<pallas_src>
import functools

import jax
import jax.numpy as jnp
from jax.experimental import pallas as pl
from jax.experimental.pallas import tpu as pltpu


def _pick_batch_tile(batch, seq, target_rows=128):
    """Smallest divisor TB of `batch` with TB*seq >= target_rows (fills the MXU
    M dimension) while keeping as many grid steps as possible (megacore)."""
    for d in range(1, batch + 1):
        if batch % d == 0 and d * seq >= target_rows:
            return d
    return batch


# ---------------------------------------------------------------------------
# Pass 1: routing kernel — gate, per-token top-1, per-batch expert histogram
# ---------------------------------------------------------------------------
def _routing_kernel(x_ref, wg_ref, bg_ref, w_ref, cnt_ref, *, num_experts, seq):
    # x_ref:   (TB, S, D)  one batch tile
    # wg_ref:  (D, E)      gate weight (pre-transposed)
    # bg_ref:  (1, E)      gate bias
    # w_ref:   (1, TB, E)  OUT: per-batch mixture weights = count_b(e)/S
    # cnt_ref: (1, 1, E)   OUT: tokens routed to each expert in this tile (i32)
    tb = x_ref.shape[0]
    m = tb * seq
    x = x_ref[...].reshape(m, x_ref.shape[2])                       # (M, D)

    gate = jnp.dot(x, wg_ref[...], preferred_element_type=jnp.float32)
    gate = gate + bg_ref[...]                                       # (M, E)
    lane = jax.lax.broadcasted_iota(jnp.int32, gate.shape, 1)
    gate_max = jnp.max(gate, axis=-1, keepdims=True)
    # first-occurrence argmax (matches torch.topk(...).indices[..., 0])
    top1 = jnp.min(jnp.where(gate == gate_max, lane, num_experts),
                   axis=-1, keepdims=True)                          # (M, 1)

    onehot = (lane == top1).astype(jnp.float32)                     # (M, E)

    # Single histogram for the whole tile: per-(batch, expert) token counts
    # via a segment matmul on the MXU (keeps the XLU free).
    tok = jax.lax.broadcasted_iota(jnp.int32, (tb, m), 1)
    row = jax.lax.broadcasted_iota(jnp.int32, (tb, m), 0)
    seg = jnp.logical_and(tok >= row * seq,
                          tok < (row + 1) * seq).astype(jnp.float32)  # (TB, M)
    counts = jnp.dot(seg, onehot, preferred_element_type=jnp.float32)  # (TB, E)

    w_ref[0] = counts * jnp.float32(1.0 / seq)
    cnt_ref[0] = jnp.sum(onehot, axis=0, keepdims=True).astype(jnp.int32)


# ---------------------------------------------------------------------------
# Pass 2: expert kernel — dense experts over the flattened tile, skip unused
# ---------------------------------------------------------------------------
def _expert_kernel(cnt_ref, x_ref, w_ref, we_ref, be_ref, o_ref, acc_ref,
                   *, num_experts):
    # cnt_ref: SMEM (num_tiles, E) i32  scalar-prefetched token counts per tile
    # x_ref:   (TB, S, D)
    # w_ref:   (1, TB, E)  per-batch mixture weights (count/S)
    # we_ref:  (E, D, D)   expert weights, pre-transposed: y = x @ we[n]
    # be_ref:  (E, 1, D)   expert biases
    # o_ref:   (TB, S, D)
    # acc_ref: VMEM (TB*S, D) f32 accumulator scratch
    t = pl.program_id(0)
    tb, s, d = x_ref.shape
    m = tb * s
    x = x_ref[...].reshape(m, d)                                    # (M, D)

    # Per-row mixture weights: broadcast each batch's weight over its S tokens.
    w_rows = jnp.broadcast_to(w_ref[0][:, None, :],
                              (tb, s, num_experts)).reshape(m, num_experts)

    acc_ref[...] = jnp.zeros_like(acc_ref)
    for n in range(num_experts):              # static unroll, E is small
        @pl.when(cnt_ref[t, n] > 0)           # skip experts with no routed tokens
        def _(n=n):
            y = jnp.dot(x, we_ref[n], preferred_element_type=jnp.float32)
            y = jnp.maximum(y + be_ref[n], 0.0)                     # relu (M, D)
            acc_ref[...] += w_rows[:, n:n + 1] * y

    o_ref[...] = acc_ref[...].reshape(tb, s, d).astype(o_ref.dtype)


# ---------------------------------------------------------------------------
# Wrapper
# ---------------------------------------------------------------------------
def moe_forward(x, wg, bg, we, be, *, num_experts):
    """x: (B, S, D) f32. wg: (E, D) torch layout. bg: (E,). we: (E, D, D). be: (E, D)."""
    B, S, D = x.shape
    E = num_experts

    # glue: pre-transpose weights / reshape biases (kernels do plain x @ W)
    wg_t = jnp.transpose(wg, (1, 0))              # (D, E)
    bg_2d = bg.reshape(1, E)                      # (1, E)
    we_t = jnp.transpose(we, (0, 2, 1))           # (E, D, D)
    be_3d = be.reshape(E, 1, D)                   # (E, 1, D)

    tb = _pick_batch_tile(B, S)                   # batch elements per grid step
    nt = B // tb                                  # number of batch tiles
    m = tb * S                                    # flattened MXU M dimension

    # ---- pass 1: routing -----------------------------------------------
    w_be, cnt3 = pl.pallas_call(
        functools.partial(_routing_kernel, num_experts=E, seq=S),
        out_shape=(jax.ShapeDtypeStruct((nt, tb, E), jnp.float32),
                   jax.ShapeDtypeStruct((nt, 1, E), jnp.int32)),
        grid_spec=pltpu.PrefetchScalarGridSpec(
            num_scalar_prefetch=0,
            grid=(nt,),
            in_specs=[
                pl.BlockSpec((tb, S, D), lambda t: (t, 0, 0)),
                pl.BlockSpec((D, E), lambda t: (0, 0)),
                pl.BlockSpec((1, E), lambda t: (0, 0)),
            ],
            out_specs=[
                pl.BlockSpec((1, tb, E), lambda t: (t, 0, 0)),
                pl.BlockSpec((1, 1, E), lambda t: (t, 0, 0)),
            ],
        ),
        compiler_params=pltpu.CompilerParams(
            dimension_semantics=("parallel",)),
    )(x, wg_t, bg_2d)
    cnt_tile = cnt3.reshape(nt, E)                # -> SMEM via scalar prefetch

    # ---- pass 2: experts -------------------------------------------------
    # NOTE: for large E*D*D, additionally single-buffer / bf16-cast / tile the
    # (E, D, D) weight block so it fits v7x's 64 MiB VMEM; trivial at demo size.
    flops = 2 * B * S * D * D * E                 # dense upper bound
    bytes_accessed = 4 * (2 * B * S * D + E * D * D + E * D + B * E)
    out = pl.pallas_call(
        functools.partial(_expert_kernel, num_experts=E),
        out_shape=jax.ShapeDtypeStruct((B, S, D), jnp.float32),
        grid_spec=pltpu.PrefetchScalarGridSpec(
            num_scalar_prefetch=1,                # cnt_tile lands in SMEM
            grid=(nt,),
            in_specs=[
                pl.BlockSpec((tb, S, D), lambda t, cnt: (t, 0, 0)),
                pl.BlockSpec((1, tb, E), lambda t, cnt: (t, 0, 0)),
                pl.BlockSpec((E, D, D), lambda t, cnt: (0, 0, 0)),
                pl.BlockSpec((E, 1, D), lambda t, cnt: (0, 0, 0)),
            ],
            out_specs=pl.BlockSpec((tb, S, D), lambda t, cnt: (t, 0, 0)),
            scratch_shapes=[pltpu.VMEM((m, D), jnp.float32)],
        ),
        compiler_params=pltpu.CompilerParams(
            dimension_semantics=("parallel",),
            vmem_limit_bytes=64 * 1024 * 1024),
        cost_estimate=pl.CostEstimate(
            flops=flops, transcendentals=0, bytes_accessed=bytes_accessed),
    )(cnt_tile, x, w_be, we_t, be_3d)
    return out


def moe_reference(x, wg, bg, we, be, *, num_experts):
    """Pure-JAX reference mirroring the PyTorch forward."""
    B, S, D = x.shape
    gate = jnp.einsum("bsd,ed->bse", x, wg) + bg          # (B, S, E)
    top1 = jnp.argmax(gate, axis=-1)                      # (B, S)
    out = jnp.zeros((B, S, D), jnp.float32)
    for n in range(num_experts):
        w = jnp.mean((top1 == n).astype(jnp.float32), axis=-1)        # (B,)
        y = jax.nn.relu(jnp.einsum("bsd,od->bso", x, we[n]) + be[n])  # (B, S, D)
        out = out + w[:, None, None] * y
    return out


if __name__ == "__main__":
    # small shapes consistent with the module; d_model chosen lane-dense (128)
    B, S, D = 8, 16, 128
    NUM_EXPERTS, K = 4, 2   # K only ever reads index 0 of topk == argmax

    key = jax.random.PRNGKey(0)
    kx, kwg, kbg, kwe, kbe = jax.random.split(key, 5)

    x = jax.random.normal(kx, (B, S, D), dtype=jnp.float32)

    # deterministic parameter init (torch Linear-style uniform bounds)
    bound = 1.0 / (D ** 0.5)
    wg = jax.random.uniform(kwg, (NUM_EXPERTS, D), jnp.float32, -bound, bound)
    bg = jax.random.uniform(kbg, (NUM_EXPERTS,), jnp.float32, -bound, bound)
    we = jax.random.uniform(kwe, (NUM_EXPERTS, D, D), jnp.float32, -bound, bound)
    be = jax.random.uniform(kbe, (NUM_EXPERTS, D), jnp.float32, -bound, bound)

    out = moe_forward(x, wg, bg, we, be, num_experts=NUM_EXPERTS)
    out = jax.block_until_ready(out)

    ref = moe_reference(x, wg, bg, we, be, num_experts=NUM_EXPERTS)
    assert out.shape == (B, S, D)
    assert jnp.allclose(out, ref, atol=2e-5, rtol=2e-5), "mismatch vs reference"

    print("KERNEL_OK")
</pallas_src>

<mosaic_0001>
module attributes {stable_mosaic.version = 11 : i64} {
  func.func @_routing_kernel(%arg0: i32, %arg1: memref<8x16x128xf32, #tpu.memory_space<vmem>>, %arg2: memref<128x4xf32, #tpu.memory_space<vmem>>, %arg3: memref<1x4xf32, #tpu.memory_space<vmem>>, %arg4: memref<1x8x4xf32, #tpu.memory_space<vmem>>, %arg5: memref<1x1x4xi32, #tpu.memory_space<vmem>>) attributes {dimension_semantics = [#tpu.dimension_semantics<parallel>], iteration_bounds = array<i64: 1>, scalar_prefetch = 0 : i64, scratch_operands = 0 : i64, tpu.core_type = #tpu.core_type<tc>, window_params = [{transform_indices = @transform_0, window_bounds = array<i64: 8, 16, 128>}, {pipeline_mode = #tpu.pipeline_mode<synchronous>, transform_indices = @transform_1, window_bounds = array<i64: 128, 4>}, {pipeline_mode = #tpu.pipeline_mode<synchronous>, transform_indices = @transform_2, window_bounds = array<i64: 1, 4>}, {transform_indices = @transform_3, window_bounds = array<i64: 1, 8, 4>}, {transform_indices = @transform_4, window_bounds = array<i64: 1, 1, 4>}]} {
    %c0 = arith.constant 0 : index
    %c0_0 = arith.constant 0 : index
    %c0_1 = arith.constant 0 : index
    %0 = vector.load %arg1[%c0, %c0_0, %c0_1] : memref<8x16x128xf32, #tpu.memory_space<vmem>>, vector<8x16x128xf32>
    %1 = vector.shape_cast %0 : vector<8x16x128xf32> to vector<128x128xf32>
    %c0_2 = arith.constant 0 : index
    %c0_3 = arith.constant 0 : index
    %2 = vector.load %arg2[%c0_2, %c0_3] : memref<128x4xf32, #tpu.memory_space<vmem>>, vector<128x4xf32>
    %cst = arith.constant dense<0.000000e+00> : vector<128x4xf32>
    %3 = tpu.matmul %1, %2, %cst {dimension_numbers = #tpu.dot_dimension_numbers<[1], [0], [0], [1], [0, 0, 1, 1], [], []>} : vector<128x128xf32>, vector<128x4xf32>, vector<128x4xf32> -> vector<128x4xf32>
    %c0_4 = arith.constant 0 : index
    %c0_5 = arith.constant 0 : index
    %4 = vector.load %arg3[%c0_4, %c0_5] : memref<1x4xf32, #tpu.memory_space<vmem>>, vector<1x4xf32>
    %5 = vector.broadcast %4 : vector<1x4xf32> to vector<128x4xf32>
    %6 = arith.addf %3, %5 : vector<128x4xf32>
    %7 = tpu.iota {dimensions = array<i32: 1>} : vector<128x4xi32>
    %cst_6 = arith.constant dense<0xFF800000> : vector<128xf32>
    %8 = vector.multi_reduction <maximumf>, %6, %cst_6 [1] : vector<128x4xf32> to vector<128xf32>
    %9 = vector.shape_cast %8 : vector<128xf32> to vector<128x1xf32>
    %10 = vector.broadcast %9 : vector<128x1xf32> to vector<128x4xf32>
    %11 = arith.cmpf oeq, %6, %10 : vector<128x4xf32>
    %c4_i32 = arith.constant 4 : i32
    %12 = vector.broadcast %c4_i32 : i32 to vector<128x4xi32>
    %13 = arith.select %11, %7, %12 : vector<128x4xi1>, vector<128x4xi32>
    %cst_7 = arith.constant dense<2147483647> : vector<128xi32>
    %14 = vector.multi_reduction <minsi>, %13, %cst_7 [1] : vector<128x4xi32> to vector<128xi32>
    %15 = vector.shape_cast %14 : vector<128xi32> to vector<128x1xi32>
    %16 = vector.broadcast %15 : vector<128x1xi32> to vector<128x4xi32>
    %17 = arith.cmpi eq, %7, %16 : vector<128x4xi32>
    %18 = arith.extui %17 : vector<128x4xi1> to vector<128x4xi32>
    %19 = arith.sitofp %18 : vector<128x4xi32> to vector<128x4xf32>
    %20 = tpu.iota {dimensions = array<i32: 1>} : vector<8x128xi32>
    %21 = tpu.iota {dimensions = array<i32: 0>} : vector<8x128xi32>
    %c16_i32 = arith.constant 16 : i32
    %22 = vector.broadcast %c16_i32 : i32 to vector<8x128xi32>
    %23 = arith.muli %21, %22 : vector<8x128xi32>
    %24 = arith.cmpi sge, %20, %23 : vector<8x128xi32>
    %c1_i32 = arith.constant 1 : i32
    %25 = vector.broadcast %c1_i32 : i32 to vector<8x128xi32>
    %26 = arith.addi %21, %25 : vector<8x128xi32>
    %c16_i32_8 = arith.constant 16 : i32
    %27 = vector.broadcast %c16_i32_8 : i32 to vector<8x128xi32>
    %28 = arith.muli %26, %27 : vector<8x128xi32>
    %29 = arith.cmpi slt, %20, %28 : vector<8x128xi32>
    %30 = arith.andi %24, %29 : vector<8x128xi1>
    %31 = arith.extui %30 : vector<8x128xi1> to vector<8x128xi32>
    %32 = arith.sitofp %31 : vector<8x128xi32> to vector<8x128xf32>
    %cst_9 = arith.constant dense<0.000000e+00> : vector<8x4xf32>
    %33 = tpu.matmul %32, %19, %cst_9 {dimension_numbers = #tpu.dot_dimension_numbers<[1], [0], [0], [1], [0, 0, 1, 1], [], []>} : vector<8x128xf32>, vector<128x4xf32>, vector<8x4xf32> -> vector<8x4xf32>
    %cst_10 = arith.constant 6.250000e-02 : f32
    %34 = vector.broadcast %cst_10 : f32 to vector<8x4xf32>
    %35 = arith.mulf %33, %34 : vector<8x4xf32>
    %c0_11 = arith.constant 0 : index
    %c0_12 = arith.constant 0 : index
    %c0_13 = arith.constant 0 : index
    %36 = vector.load %arg4[%c0_11, %c0_12, %c0_13] : memref<1x8x4xf32, #tpu.memory_space<vmem>>, vector<1x8x4xf32>
    %37 = vector.shape_cast %36 : vector<1x8x4xf32> to vector<8x4xf32>
    %38 = vector.shape_cast %35 : vector<8x4xf32> to vector<1x8x4xf32>
    tpu.vector_store %arg4[%c0_11, %c0_12, %c0_13], %38 {strides = array<i32>} : memref<1x8x4xf32, #tpu.memory_space<vmem>>, vector<1x8x4xf32>,
    %cst_14 = arith.constant dense<0.000000e+00> : vector<4xf32>
    %39 = vector.multi_reduction <add>, %19, %cst_14 [0] : vector<128x4xf32> to vector<4xf32>
    %40 = vector.shape_cast %39 : vector<4xf32> to vector<1x4xf32>
    %41 = arith.fptosi %40 : vector<1x4xf32> to vector<1x4xi32>
    %c0_15 = arith.constant 0 : index
    %c0_16 = arith.constant 0 : index
    %c0_17 = arith.constant 0 : index
    %42 = vector.load %arg5[%c0_15, %c0_16, %c0_17] : memref<1x1x4xi32, #tpu.memory_space<vmem>>, vector<1x1x4xi32>
    %43 = vector.shape_cast %42 : vector<1x1x4xi32> to vector<1x4xi32>
    %44 = vector.shape_cast %41 : vector<1x4xi32> to vector<1x1x4xi32>
    tpu.vector_store %arg5[%c0_15, %c0_16, %c0_17], %44 {strides = array<i32>} : memref<1x1x4xi32, #tpu.memory_space<vmem>>, vector<1x1x4xi32>,
    return
  }
  func.func @transform_0(%arg0: i32) -> (i32, i32, i32) {
    %c0_i32 = arith.constant 0 : i32
    %c0_i32_0 = arith.constant 0 : i32
    %c0_i32_1 = arith.constant 0 : i32
    return %arg0, %c0_i32, %c0_i32_0 : i32, i32, i32
  }
  func.func @transform_1(%arg0: i32) -> (i32, i32) {
    %c0_i32 = arith.constant 0 : i32
    %c0_i32_0 = arith.constant 0 : i32
    %c0_i32_1 = arith.constant 0 : i32
    return %c0_i32, %c0_i32_0 : i32, i32
  }
  func.func @transform_2(%arg0: i32) -> (i32, i32) {
    %c0_i32 = arith.constant 0 : i32
    %c0_i32_0 = arith.constant 0 : i32
    %c0_i32_1 = arith.constant 0 : i32
    return %c0_i32, %c0_i32_0 : i32, i32
  }
  func.func @transform_3(%arg0: i32) -> (i32, i32, i32) {
    %c0_i32 = arith.constant 0 : i32
    %c0_i32_0 = arith.constant 0 : i32
    %c0_i32_1 = arith.constant 0 : i32
    return %arg0, %c0_i32, %c0_i32_0 : i32, i32, i32
  }
  func.func @transform_4(%arg0: i32) -> (i32, i32, i32) {
    %c0_i32 = arith.constant 0 : i32
    %c0_i32_0 = arith.constant 0 : i32
    %c0_i32_1 = arith.constant 0 : i32
    return %arg0, %c0_i32, %c0_i32_0 : i32, i32, i32
  }
}

</mosaic_0001>

<bundles_post_ra>
// kernel: tpu_custom_call.1
= control target key start
LH: loop header
LB: loop body
LE: loop exit
PB: predicated region body
PF: predicated region fallthrough
CT: control target
= control target key end

     0   :  { %s1500_s0 = inlined_call_operand.vmem [shape: f32[8,16,128], index: 0, kind: input, shape index: {}]   ;;  %s1501_s1 = inlined_call_operand.vmem [shape: f32[128,4], index: 1, kind: input, shape index: {}]   ;;  %s1502_s2 = inlined_call_operand.vmem [shape: f32[1,4], index: 2, kind: input, shape index: {}]   ;;  %s1503_s3 = inlined_call_operand.vmem [shape: f32[1,8,4], index: 3, kind: output, shape index: {0}]   ;;  %s1504_s4 = inlined_call_operand.hbm [shape: s32[1,1,4], index: 4, kind: output, shape index: {1}]  }
   0x1   :  { %v33_v0 = vld [vmem:[%s1501_s1] sm:$0xff]  ;;  %v34_v1 = vld [vmem:[%s1501_s1 + $0x8] sm:$0xff]  ;;  %v35_v2 = vld [vmem:[%s1501_s1 + $0x10] sm:$0xff] }
   0x2   :  { %v887_v3 = vpack.c.bf16 %v34_v1, %v33_v0  ;;  %v36_v4 = vld [vmem:[%s1501_s1 + $0x18] sm:$0xff]  ;;  %v37_v6 = vld [vmem:[%s1501_s1 + $0x20] sm:$0xff]  ;;  %v38_v7 = vld [vmem:[%s1501_s1 + $0x28] sm:$0xff] }
   0x3   :  { %v891_v5 = vpack.c.bf16 %v36_v4, %v35_v2  ;;  %v895_v8 = vpack.c.bf16 %v38_v7, %v37_v6  ;;  %v17_v9 = vld [vmem:[%s1500_s0] sm:$0xff]  ;;  %v39_v10 = vld [vmem:[%s1501_s1 + $0x30] sm:$0xff]  ;;  %v40_v11 = vld [vmem:[%s1501_s1 + $0x38] sm:$0xff] }
   0x4   :  { %888 = vmatprep.subr.bf16.mxu0 %v887_v3  ;;  %828 = vmatprep.mubr.f32.mxu0 %v17_v9  ;;  %v899_v12 = vpack.c.bf16 %v40_v11, %v39_v10  ;;  %v41_v13 = vld [vmem:[%s1501_s1 + $0x40] sm:$0xff]  ;;  %v42_v14 = vld [vmem:[%s1501_s1 + $0x48] sm:$0xff] }
   0x5   :  { %890 = vmatpush3.bf16.msra.mxu0 %v887_v3 }
   0x6   :  { %892 = vmatprep.subr.bf16.mxu0 %v891_v5 }
   0x9   :  { %894 = vmatpush3.bf16.msra.mxu0 %v891_v5 }
   0xa   :  { %896 = vmatprep.subr.bf16.mxu0 %v895_v8 }
   0xb   :  { %10 = vsyncpa [#allocation3], 0  ;;  %v903_v15 = vpack.c.bf16 %v42_v14, %v41_v13  ;;  %v43_v16 = vld [vmem:[%s1501_s1 + $0x50] sm:$0xff]  ;;  %v44_v17 = vld [vmem:[%s1501_s1 + $0x58] sm:$0xff]  ;;  %vm203_vm0 = vcmask 31744  }
   0xc   :  { %v907_v18 = vpack.c.bf16 %v44_v17, %v43_v16  ;;  %v45_v19 = vld [vmem:[%s1501_s1 + $0x60] sm:$0xff]  ;;  %v46_v20 = vld [vmem:[%s1501_s1 + $0x68] sm:$0xff]  ;;  %v47_v22 = vld [vmem:[%s1501_s1 + $0x70] sm:$0xff] }
   0xd   :  { %898 = vmatpush3.bf16.msra.mxu0 %v895_v8  ;;  %v911_v21 = vpack.c.bf16 %v46_v20, %v45_v19  ;;  %v48_v23 = vld [vmem:[%s1501_s1 + $0x78] sm:$0xff]  ;;  %v18_v25 = vld [vmem:[%s1500_s0 + $0x8] sm:$0xff]  ;;  %v19_v26 = vld [vmem:[%s1500_s0 + $0x10] sm:$0xff] }
   0xe   :  { %900 = vmatprep.subr.bf16.mxu0 %v899_v12  ;;  %v915_v24 = vpack.c.bf16 %v48_v23, %v47_v22  ;;  %v20_v27 = vld [vmem:[%s1500_s0 + $0x18] sm:$0xff]  ;;  %v21_v28 = vld [vmem:[%s1500_s0 + $0x20] sm:$0xff]  ;;  %v22_v29 = vld [vmem:[%s1500_s0 + $0x28] sm:$0xff] }
   0xf   :  { %v23_v30 = vld [vmem:[%s1500_s0 + $0x30] sm:$0xff]  ;;  %v24_v31 = vld [vmem:[%s1500_s0 + $0x38] sm:$0xff]  ;;  %v25_v32 = vld [vmem:[%s1500_s0 + $0x40] sm:$0xff] }
  0x10   :  { %v26_v33 = vld [vmem:[%s1500_s0 + $0x48] sm:$0xff]  ;;  %v27_v34 = vld [vmem:[%s1500_s0 + $0x50] sm:$0xff]  ;;  %v28_v35 = vld [vmem:[%s1500_s0 + $0x58] sm:$0xff] }
  0x11   :  { %902 = vmatpush3.bf16.msra.mxu0 %v899_v12  ;;  %v29_v36 = vld [vmem:[%s1500_s0 + $0x60] sm:$0xff]  ;;  %v30_v37 = vld [vmem:[%s1500_s0 + $0x68] sm:$0xff]  ;;  %v31_v38 = vld [vmem:[%s1500_s0 + $0x70] sm:$0xff] }
  0x12   :  { %904 = vmatprep.subr.bf16.mxu0 %v903_v15  ;;  %v32_v39 = vld [vmem:[%s1500_s0 + $0x78] sm:$0xff]  ;;  %v712_v40 = vld [vmem:[%s1502_s2] ss:$0 sm:$0xff]  ;;  %s980_s0 = smov [#allocation2]  }
  0x13   :  { %s702_s2 = sshll.u32 %s980_s0, 4  ;;  %s703_s2 = int_to_ptr.vmem [resolvable:$true] %s702_s2 }
  0x14   :  { %s951_s28 = scalar_lea.vmem %s703_s2, 16  ;;  %s955_s1 = scalar_lea.vmem %s703_s2, 32 }
  0x15   :  { %906 = vmatpush3.bf16.msra.mxu0 %v903_v15  ;;  %p952_p0 = scmp.ne.s32.totalorder %s703_s2, %s951_s28  ;;  %p956_p1 = scmp.lt.s32.totalorder %s703_s2, %s703_s2 }
  0x16   :  { %908 = vmatprep.subr.bf16.mxu0 %v907_v18  ;;  %p957_p2 = scmp.lt.s32.totalorder %s955_s1, %s951_s28 }
  0x18   :  { %p958_p3 = por %p957_p2, %p956_p1 }
  0x19   :  { %910 = vmatpush3.bf16.msra.mxu0 %v907_v18 }
  0x1a   :  { %912 = vmatprep.subr.bf16.mxu0 %v911_v21  ;;  %p959_p4 = pnand %p958_p3, %p952_p0 }
  0x1d   :  { %914 = vmatpush3.bf16.msra.mxu0 %v911_v21 }
  0x1e   :  { %916 = vmatprep.subr.bf16.mxu0 %v915_v24 }
  0x21   :  { %918 = vmatpush3.bf16.msra.mxu0 %v915_v24 }
  0x24   :  { %829 = vmatmul.mubr.f32.vlgmr.msra.gmra.mrb[0].mxu0 %v18_v25  ;;  %v201_v25 = vlaneseq }
  0x25   :  { %831 = vmatprep.mubr.f32.mxu0 %v19_v26 }
  0x26   :  { %v1170_v26 = vand.u32 127, %v201_v25 }
  0x28   :  { %832 = vmatmul.mubr.f32.gmra.mrb[2].mxu0 %v20_v27 }
  0x29   :  { %834 = vmatprep.mubr.f32.mxu0 %v21_v28 }
  0x2c   :  { %835 = vmatmul.mubr.f32.gmra.mrb[4].mxu0 %v22_v29 }
  0x2d   :  { %837 = vmatprep.mubr.f32.mxu0 %v23_v30 }
  0x30   :  { %838 = vmatmul.mubr.f32.gmra.mrb[6].mxu0 %v24_v31 }
  0x31   :  { %840 = vmatprep.mubr.f32.mxu0 %v25_v32 }
  0x34   :  { %841 = vmatmul.mubr.f32.gmra.mrb[8].mxu0 %v26_v33 }
  0x35   :  { %843 = vmatprep.mubr.f32.mxu0 %v27_v34 }
  0x38   :  { %844 = vmatmul.mubr.f32.gmra.mrb[10].mxu0 %v28_v35 }
  0x39   :  { %846 = vmatprep.mubr.f32.mxu0 %v29_v36 }
  0x3c   :  { %847 = vmatmul.mubr.f32.gmra.mrb[12].mxu0 %v30_v37 }
  0x3d   :  { %849 = vmatprep.mubr.f32.mxu0 %v31_v38 }
  0x40   :  { %850 = vmatmul.mubr.f32.gmra.mrb[14].mxu0 %v32_v39 }
  0xf7   :  { %v830_v41 = vpop.f32.mrb[0].mxu0 }
  0xf8   :  { %v122_v42 = vpop.f32.mrb[1].mxu0  ;;  %v1107_v44 = vadd.f32 %v830_v41, %v712_v40 }
  0xf9   :  { %v1105_v43 = vadd.f32 %v712_v40, %v122_v42 }
  0xfa   :  { %v207_v52 = vsel %vm203_vm0, %v1107_v44, -inf }
  0xfb   :  { %v833_v45 = vpop.f32.mrb[2].mxu0  ;;  %v204_v46 = vsel %vm203_vm0, %v1105_v43, -inf }
  0xfc   :  { %v1111_v47 = vadd.f32 %v833_v45, %v712_v40  ;;  %v132_v48 = vpop.f32.mrb[3].mxu0  ;;  %205 = vmax.xlane.f32.xlu0 %v204_v46 }
  0xfd   :  { %v1113_v49 = vadd.f32 %v712_v40, %v132_v48 }
  0xfe   :  { %v213_v50 = vsel %vm203_vm0, %v1111_v47, -inf }
  0xff   :  { %214 = vmax.xlane.f32.xlu1 %v213_v50  ;;  %v836_v51 = vpop.f32.mrb[4].mxu0  ;;  %v210_v56 = vsel %vm203_vm0, %v1113_v49, -inf }
 0x100   :  { %v1119_v53 = vadd.f32 %v836_v51, %v712_v40  ;;  %v142_v54 = vpop.f32.mrb[5].mxu0  ;;  %208 = vmax.xlane.f32.xlu0 %v207_v52 }
 0x101   :  { %v1121_v55 = vadd.f32 %v712_v40, %v142_v54 }
 0x102   :  { %v219_v61 = vsel %vm203_vm0, %v1119_v53, -inf }
 0x103   :  { %v839_v57 = vpop.f32.mrb[6].mxu0  ;;  %211 = vmax.xlane.f32.xlu1 %v210_v56  ;;  %v216_v58 = vsel %vm203_vm0, %v1121_v55, -inf }
 0x104   :  { %v1127_v59 = vadd.f32 %v839_v57, %v712_v40  ;;  %v152_v60 = vpop.f32.mrb[7].mxu0  ;;  %217 = vmax.xlane.f32.xlu0 %v216_v58 }
 0x105   :  { %v1131_v62 = vadd.f32 %v712_v40, %v152_v60 }
 0x106   :  { %v225_v3 = vsel %vm203_vm0, %v1127_v59, -inf }
 0x107   :  { %v842_v63 = vpop.f32.mrb[8].mxu0  ;;  %220 = vmax.xlane.f32.xlu1 %v219_v61  ;;  %v222_v0 = vsel %vm203_vm0, %v1131_v62, -inf }
 0x108   :  { %v1135_v1 = vadd.f32 %v842_v63, %v712_v40  ;;  %v162_v2 = vpop.f32.mrb[9].mxu0  ;;  %223 = vmax.xlane.f32.xlu0 %v222_v0 }
 0x109   :  { %v1139_v4 = vadd.f32 %v712_v40, %v162_v2 }
 0x10a   :  { %v231_v9 = vsel %vm203_vm0, %v1135_v1, -inf }
 0x10b   :  { %v845_v5 = vpop.f32.mrb[10].mxu0  ;;  %226 = vmax.xlane.f32.xlu1 %v225_v3  ;;  %v228_v6 = vsel %vm203_vm0, %v1139_v4, -inf }
 0x10c   :  { %v1143_v7 = vadd.f32 %v845_v5, %v712_v40  ;;  %v172_v8 = vpop.f32.mrb[11].mxu0  ;;  %229 = vmax.xlane.f32.xlu0 %v228_v6 }
 0x10d   :  { %v1147_v10 = vadd.f32 %v712_v40, %v172_v8 }
 0x10e   :  { %v237_v15 = vsel %vm203_vm0, %v1143_v7, -inf }
 0x10f   :  { %v848_v11 = vpop.f32.mrb[12].mxu0  ;;  %232 = vmax.xlane.f32.xlu1 %v231_v9  ;;  %v234_v12 = vsel %vm203_vm0, %v1147_v10, -inf }
 0x110   :  { %v1151_v13 = vadd.f32 %v848_v11, %v712_v40  ;;  %v182_v14 = vpop.f32.mrb[13].mxu0  ;;  %235 = vmax.xlane.f32.xlu0 %v234_v12 }
 0x111   :  { %v1155_v16 = vadd.f32 %v712_v40, %v182_v14 }
 0x112   :  { %v243_v21 = vsel %vm203_vm0, %v1151_v13, -inf }
 0x113   :  { %v851_v17 = vpop.f32.mrb[14].mxu0  ;;  %238 = vmax.xlane.f32.xlu1 %v237_v15  ;;  %v240_v18 = vsel %vm203_vm0, %v1155_v16, -inf }
 0x114   :  { %v1159_v19 = vadd.f32 %v851_v17, %v712_v40  ;;  %v192_v20 = vpop.f32.mrb[15].mxu0  ;;  %241 = vmax.xlane.f32.xlu0 %v240_v18 }
 0x115   :  { %v1163_v22 = vadd.f32 %v712_v40, %v192_v20 }
 0x116   :  { %v249_v24 = vsel %vm203_vm0, %v1159_v19, -inf }
 0x117   :  { %244 = vmax.xlane.f32.xlu1 %v243_v21  ;;  %v246_v23 = vsel %vm203_vm0, %v1163_v22, -inf }
 0x118   :  { %247 = vmax.xlane.f32.xlu0 %v246_v23 }
 0x11b   :  { %250 = vmax.xlane.f32.xlu1 %v249_v24 }
 0x189   :  { %v206_v27 = vpop.xlane.xlu0 %205 }
 0x18a   :  { %vm252_vm1 = vcmp.eq.f32.partialorder %v1105_v43, %v206_v27 }
 0x18b   :  { %v268_v28 = vsel %vm252_vm1, %v1170_v26, 4 }
 0x18c   :  { %v1175_v29 = vsel %vm203_vm0, %v268_v28, 2147483647  ;;  %v215_v30 = vpop.xlane.xlu1 %214 }
 0x18d   :  { %vm255_vm2 = vcmp.eq.f32.partialorder %v1111_v47, %v215_v30  ;;  %v209_v31 = vpop.xlane.xlu0 %208  ;;  %v286_v32 = vshra.s32 %v1175_v29, 16 }
 0x18e   :  { %v271_v33 = vsel %vm255_vm2, %v1170_v26, 4  ;;  %vm253_vm3 = vcmp.eq.f32.partialorder %v1107_v44, %v209_v31 }
 0x18f   :  { %v269_v34 = vsel %vm253_vm3, %v1170_v26, 4  ;;  %v1182_v35 = vcvt.s32.f32 %v286_v32  ;;  %v1185_v36 = vsel %vm203_vm0, %v271_v33, 2147483647 }
 0x190   :  { %v1188_v37 = vsel %vm203_vm0, %v269_v34, 2147483647  ;;  %v212_v38 = vpop.xlane.xlu1 %211  ;;  %v331_v45 = vshra.s32 %v1185_v36, 16 }
 0x191   :  { %vm254_vm4 = vcmp.eq.f32.partialorder %v1113_v49, %v212_v38  ;;  %289 = vmin.xlane.f32.xlu0 %v1182_v35  ;;  %v218_v39 = vpop.xlane.xlu0 %217  ;;  %v301_v40 = vshra.s32 %v1188_v37, 16 }
 0x192   :  { %v270_v41 = vsel %vm254_vm4, %v1170_v26, 4  ;;  %vm256_vm5 = vcmp.eq.f32.partialorder %v1121_v55, %v218_v39  ;;  %v1217_v56 = vcvt.s32.f32 %v331_v45 }
 0x193   :  { %v1196_v42 = vsel %vm203_vm0, %v270_v41, 2147483647  ;;  %v272_v43 = vsel %vm256_vm5, %v1170_v26, 4  ;;  %v1199_v44 = vcvt.s32.f32 %v301_v40 }
 0x194   :  { %v1203_v46 = vsel %vm203_vm0, %v272_v43, 2147483647  ;;  %v221_v47 = vpop.xlane.xlu1 %220  ;;  %v316_v48 = vshra.s32 %v1196_v42, 16 }
 0x195   :  { %vm257_vm6 = vcmp.eq.f32.partialorder %v1119_v53, %v221_v47  ;;  %304 = vmin.xlane.f32.xlu1 %v1199_v44  ;;  %v224_v49 = vpop.xlane.xlu0 %223  ;;  %v346_v52 = vshra.s32 %v1203_v46, 16 }
 0x196   :  { %v273_v50 = vsel %vm257_vm6, %v1170_v26, 4  ;;  %vm258_vm7 = vcmp.eq.f32.partialorder %v1131_v62, %v224_v49  ;;  %v1210_v51 = vcvt.s32.f32 %v316_v48 }
 0x197   :  { %v1214_v54 = vsel %vm203_vm0, %v273_v50, 2147483647  ;;  %v274_v55 = vsel %vm258_vm7, %v1170_v26, 4  ;;  %v1229_v63 = vcvt.s32.f32 %v346_v52 }
 0x198   :  { %v1220_v53 = vsel %vm203_vm0, %v274_v55, 2147483647  ;;  %v227_v57 = vpop.xlane.xlu1 %226  ;;  %319 = vmin.xlane.f32.xlu0 %v1210_v51  ;;  %v361_v58 = vshra.s32 %v1214_v54, 16  ;;  %v285_v55 = vand.u32 65535, %v1175_v29 }
 0x199   :  { %vm259_vm8 = vcmp.eq.f32.partialorder %v1127_v59, %v227_v57  ;;  %334 = vmin.xlane.f32.xlu1 %v1217_v56  ;;  %v230_v60 = vpop.xlane.xlu0 %229  ;;  %v376_v61 = vshra.s32 %v1220_v53, 16 }
 0x19a   :  { %v275_v62 = vsel %vm259_vm8, %v1170_v26, 4  ;;  %vm260_vm9 = vcmp.eq.f32.partialorder %v1139_v4, %v230_v60  ;;  %v1231_v0 = vcvt.s32.f32 %v361_v58  ;;  %v287_v58 = vcvt.s32.f32 %v285_v55 }
 0x19b   :  { %v1234_v2 = vsel %vm203_vm0, %v275_v62, 2147483647  ;;  %v276_v3 = vsel %vm260_vm9, %v1170_v26, 4  ;;  %v1244_v8 = vcvt.s32.f32 %v376_v61  ;;  %v300_v60 = vand.u32 65535, %v1188_v37 }
 0x19c   :  { %v1238_v59 = vsel %vm203_vm0, %v276_v3, 2147483647  ;;  %v233_v5 = vpop.xlane.xlu1 %232  ;;  %349 = vmin.xlane.f32.xlu0 %v1229_v63  ;;  %v391_v6 = vshra.s32 %v1234_v2, 16  ;;  %v315_v62 = vand.u32 65535, %v1196_v42 }
 0x19d   :  { %vm261_vm10 = vcmp.eq.f32.partialorder %v1135_v1, %v233_v5  ;;  %364 = vmin.xlane.f32.xlu1 %v1231_v0  ;;  %v236_v4 = vpop.xlane.xlu0 %235  ;;  %v406_v12 = vshra.s32 %v1238_v59, 16  ;;  %v302_v5 = vcvt.s32.f32 %v300_v60 }
 0x19e   :  { %v277_v9 = vsel %vm261_vm10, %v1170_v26, 4  ;;  %vm262_vm11 = vcmp.eq.f32.partialorder %v1147_v10, %v236_v4  ;;  %v1248_v11 = vcvt.s32.f32 %v391_v6  ;;  %v330_v6 = vand.u32 65535, %v1185_v36 }
 0x19f   :  { %v1252_v14 = vsel %vm203_vm0, %v277_v9, 2147483647  ;;  %v278_v15 = vsel %vm262_vm11, %v1170_v26, 4  ;;  %v1265_v23 = vcvt.s32.f32 %v406_v12  ;;  %v317_v37 = vcvt.s32.f32 %v315_v62 }
 0x1a0   :  { %v1256_v1 = vsel %vm203_vm0, %v278_v15, 2147483647  ;;  %v239_v17 = vpop.xlane.xlu1 %238  ;;  %379 = vmin.xlane.f32.xlu0 %v1244_v8  ;;  %v421_v18 = vshra.s32 %v1252_v14, 16  ;;  %v345_v9 = vand.u32 65535, %v1203_v46  ;;  %v332_v42 = vcvt.s32.f32 %v330_v6 }
 0x1a1   :  { %vm263_vm12 = vcmp.eq.f32.partialorder %v1143_v7, %v239_v17  ;;  %394 = vmin.xlane.f32.xlu1 %v1248_v11  ;;  %v242_v10 = vpop.xlane.xlu0 %241  ;;  %v436_v20 = vshra.s32 %v1256_v1, 16  ;;  %v360_v12 = vand.u32 65535, %v1214_v54  ;;  %v375_v46 = vand.u32 65535, %v1220_v53 }
 0x1a2   :  { %v279_v21 = vsel %vm263_vm12, %v1170_v26, 4  ;;  %vm264_vm13 = vcmp.eq.f32.partialorder %v1155_v16, %v242_v10  ;;  %v1267_v24 = vcvt.s32.f32 %v421_v18  ;;  %v347_v17 = vcvt.s32.f32 %v345_v9 }
 0x1a3   :  { %v1270_v27 = vsel %vm203_vm0, %v279_v21, 2147483647  ;;  %v280_v28 = vsel %vm264_vm13, %v1170_v26, 4  ;;  %v1280_v32 = vcvt.s32.f32 %v436_v20  ;;  %v390_v54 = vand.u32 65535, %v1234_v2 }
 0x1a4   :  { %v1274_v7 = vsel %vm203_vm0, %v280_v28, 2147483647  ;;  %v245_v30 = vpop.xlane.xlu1 %244  ;;  %409 = vmin.xlane.f32.xlu0 %v1265_v23  ;;  %v451_v31 = vshra.s32 %v1270_v27, 16  ;;  %v377_v21 = vcvt.s32.f32 %v375_v46  ;;  %v405_v53 = vand.u32 65535, %v1238_v59 }
 0x1a5   :  { %vm265_vm14 = vcmp.eq.f32.partialorder %v1151_v13, %v245_v30  ;;  %424 = vmin.xlane.f32.xlu1 %v1267_v24  ;;  %v248_v16 = vpop.xlane.xlu0 %247  ;;  %v466_v38 = vshra.s32 %v1274_v7, 16  ;;  %v420_v2 = vand.u32 65535, %v1252_v14  ;;  %v435_v59 = vand.u32 65535, %v1256_v1 }
 0x1a6   :  { %v281_v33 = vsel %vm265_vm14, %v1170_v26, 4  ;;  %vm266_vm15 = vcmp.eq.f32.partialorder %v1163_v22, %v248_v16  ;;  %v1284_v34 = vcvt.s32.f32 %v451_v31  ;;  %v407_v16 = vcvt.s32.f32 %v405_v53 }
 0x1a7   :  { %v1288_v39 = vsel %vm203_vm0, %v281_v33, 2147483647  ;;  %v282_v40 = vsel %vm266_vm15, %v1170_v26, 4  ;;  %v1299_v45 = vcvt.s32.f32 %v466_v38  ;;  %v450_v14 = vand.u32 65535, %v1270_v27 }
 0x1a8   :  { %v1292_v13 = vsel %vm203_vm0, %v282_v40, 2147483647  ;;  %v251_v41 = vpop.xlane.xlu1 %250  ;;  %439 = vmin.xlane.f32.xlu0 %v1280_v32  ;;  %v481_v43 = vshra.s32 %v1288_v39, 16  ;;  %v465_v1 = vand.u32 65535, %v1274_v7  ;;  %v480_v27 = vand.u32 65535, %v1288_v39 }
 0x1a9   :  { %vm267_vm1 = vcmp.eq.f32.partialorder %v1159_v19, %v251_v41  ;;  %454 = vmin.xlane.f32.xlu1 %v1284_v34  ;;  %v496_v48 = vshra.s32 %v1292_v13, 16  ;;  %v437_v41 = vcvt.s32.f32 %v435_v59  ;;  %v495_v55 = vand.u32 65535, %v1292_v13 }
 0x1aa   :  { %v283_v22 = vsel %vm267_vm1, %v1170_v26, 4  ;;  %v1301_v47 = vcvt.s32.f32 %v481_v43  ;;  %v467_v7 = vcvt.s32.f32 %v465_v1 }
 0x1ab   :  { %v1305_v49 = vsel %vm203_vm0, %v283_v22, 2147483647  ;;  %v1310_v19 = vcvt.s32.f32 %v496_v48  ;;  %v975_v48 = vmov 0.0|0.0   ;;  %v497_v62 = vcvt.s32.f32 %v495_v55 }
 0x1ac   :  { %469 = vmin.xlane.f32.xlu0 %v1299_v45  ;;  %v511_v50 = vshra.s32 %v1305_v49, 16  ;;  %919 = vmatprep.subr.bf16.mxu1 %v975_v48  ;;  %v510_v39 = vand.u32 65535, %v1305_v49 }
 0x1ad   :  { %484 = vmin.xlane.f32.xlu1 %v1301_v47 }
 0x1ae   :  { %v1312_v52 = vcvt.s32.f32 %v511_v50  ;;  %v512_v13 = vcvt.s32.f32 %v510_v39 }
 0x1b0   :  { %499 = vmin.xlane.f32.xlu0 %v1310_v19 }
 0x1b1   :  { %514 = vmin.xlane.f32.xlu1 %v1312_v52 }
 0x21e   :  { %v1317_v57 = vpop.xlane.xlu0 %289 }
 0x21f   :  { %vm291_vm2 = vcmp.eq.f32.partialorder %v1182_v35, %v1317_v57  ;;  %v296_v6 = vcvt.f32.s32 %v1317_v57 }
 0x220   :  { %v292_v61 = vsel %vm291_vm2, %v287_v58, inf }
 0x221   :  { %293 = vmin.xlane.f32.xlu0 %v292_v61 }
 0x222   :  { %v1323_v3 = vpop.xlane.xlu1 %304 }
 0x223   :  { %vm306_vm3 = vcmp.eq.f32.partialorder %v1199_v44, %v1323_v3  ;;  %v311_v9 = vcvt.f32.s32 %v1323_v3 }
 0x224   :  { %v307_v29 = vsel %vm306_vm3, %v302_v5, inf  ;;  %vm976_vm3 = vmmov 0  }
 0x225   :  { %308 = vmin.xlane.f32.xlu1 %v307_v29  ;;  %v1328_v4 = vpop.xlane.xlu0 %319 }
 0x226   :  { %v1331_v35 = vpop.xlane.xlu1 %334  ;;  %vm321_vm4 = vcmp.eq.f32.partialorder %v1210_v51, %v1328_v4  ;;  %v362_v51 = vcvt.s32.f32 %v360_v12  ;;  %v326_v12 = vcvt.f32.s32 %v1328_v4 }
 0x227   :  { %v322_v15 = vsel %vm321_vm4, %v317_v37, inf  ;;  %vm336_vm5 = vcmp.eq.f32.partialorder %v1217_v56, %v1331_v35  ;;  %v297_v37 = vshll.u32 %v296_v6, 16 }
 0x228   :  { %323 = vmin.xlane.f32.xlu0 %v322_v15  ;;  %v337_v36 = vsel %vm336_vm5, %v332_v42, inf }
 0x229   :  { %338 = vmin.xlane.f32.xlu1 %v337_v36  ;;  %v1338_v44 = vpop.xlane.xlu0 %349  ;;  %v312_v36 = vshll.u32 %v311_v9, 16 }
 0x22a   :  { %v1341_v18 = vpop.xlane.xlu1 %364  ;;  %vm351_vm6 = vcmp.eq.f32.partialorder %v1229_v63, %v1338_v44  ;;  %v392_v63 = vcvt.s32.f32 %v390_v54  ;;  %v356_v46 = vcvt.f32.s32 %v1338_v44 }
 0x22b   :  { %v352_v10 = vsel %vm351_vm6, %v347_v17, inf  ;;  %vm366_vm7 = vcmp.eq.f32.partialorder %v1231_v0, %v1341_v18 }
 0x22c   :  { %353 = vmin.xlane.f32.xlu0 %v352_v10  ;;  %v367_v56 = vsel %vm366_vm7, %v362_v51, inf  ;;  %v371_v51 = vcvt.f32.s32 %v1341_v18  ;;  %v327_v10 = vshll.u32 %v326_v12, 16 }
 0x22d   :  { %368 = vmin.xlane.f32.xlu1 %v367_v56  ;;  %v1348_v20 = vpop.xlane.xlu0 %379 }
 0x22e   :  { %v1351_v28 = vpop.xlane.xlu1 %394  ;;  %vm381_vm8 = vcmp.eq.f32.partialorder %v1244_v8, %v1348_v20  ;;  %v422_v8 = vcvt.s32.f32 %v420_v2  ;;  %v386_v53 = vcvt.f32.s32 %v1348_v20 }
 0x22f   :  { %v382_v30 = vsel %vm381_vm8, %v377_v21, inf  ;;  %vm396_vm9 = vcmp.eq.f32.partialorder %v1248_v11, %v1351_v28  ;;  %v401_v44 = vcvt.f32.s32 %v1351_v28 }
 0x230   :  { %383 = vmin.xlane.f32.xlu0 %v382_v30  ;;  %v397_v0 = vsel %vm396_vm9, %v392_v63, inf  ;;  %v357_v63 = vshll.u32 %v356_v46, 16  ;;  %v372_v30 = vshll.u32 %v371_v51, 16 }
 0x231   :  { %398 = vmin.xlane.f32.xlu1 %v397_v0  ;;  %v1358_v31 = vpop.xlane.xlu0 %409 }
 0x232   :  { %v1361_v33 = vpop.xlane.xlu1 %424  ;;  %vm411_vm10 = vcmp.eq.f32.partialorder %v1265_v23, %v1358_v31  ;;  %v452_v23 = vcvt.s32.f32 %v450_v14  ;;  %v416_v14 = vcvt.f32.s32 %v1358_v31 }
 0x233   :  { %v412_v38 = vsel %vm411_vm10, %v407_v16, inf  ;;  %vm426_vm11 = vcmp.eq.f32.partialorder %v1267_v24, %v1361_v33  ;;  %v978_v16 = vmov 1.0|1.0  }
 0x234   :  { %413 = vmin.xlane.f32.xlu0 %v412_v38  ;;  %v427_v11 = vsel %vm426_vm11, %v422_v8, inf }
 0x235   :  { %428 = vmin.xlane.f32.xlu1 %v427_v11  ;;  %v1368_v40 = vpop.xlane.xlu0 %439 }
 0x236   :  { %v1371_v43 = vpop.xlane.xlu1 %454  ;;  %vm441_vm12 = vcmp.eq.f32.partialorder %v1280_v32, %v1368_v40  ;;  %v482_v32 = vcvt.s32.f32 %v480_v27  ;;  %v402_v27 = vshll.u32 %v401_v44, 16 }
 0x237   :  { %v442_v22 = vsel %vm441_vm12, %v437_v41, inf  ;;  %vm456_vm13 = vcmp.eq.f32.partialorder %v1284_v34, %v1371_v43  ;;  %v387_v41 = vshll.u32 %v386_v53, 16 }
 0x238   :  { %443 = vmin.xlane.f32.xlu0 %v442_v22  ;;  %v457_v24 = vsel %vm456_vm13, %v452_v23, inf }
 0x239   :  { %458 = vmin.xlane.f32.xlu1 %v457_v24  ;;  %v1379_v50 = vpop.xlane.xlu0 %469 }
 0x23a   :  { %v1382_v58 = vpop.xlane.xlu1 %484  ;;  %vm471_vm14 = vcmp.eq.f32.partialorder %v1299_v45, %v1379_v50 }
 0x23b   :  { %v472_v34 = vsel %vm471_vm14, %v467_v7, inf  ;;  %vm486_vm15 = vcmp.eq.f32.partialorder %v1301_v47, %v1382_v58  ;;  %v977_v47 = vmov 0.0   ;;  %v431_v7 = vcvt.f32.s32 %v1361_v33 }
 0x23c   :  { %473 = vmin.xlane.f32.xlu0 %v472_v34  ;;  %v487_v60 = vsel %vm486_vm15, %v482_v32, inf  ;;  %884 = vmatprep.mubr.msk.f32.mxu1 %vm976_vm3, %v977_v47 }
 0x23d   :  { %488 = vmin.xlane.f32.xlu1 %v487_v60  ;;  %v1389_v61 = vpop.xlane.xlu0 %499  ;;  %v417_v60 = vshll.u32 %v416_v14, 16 }
 0x23e   :  { %v1391_v5 = vpop.xlane.xlu1 %514  ;;  %vm501_vm1 = vcmp.eq.f32.partialorder %v1310_v19, %v1389_v61 }
 0x23f   :  { %v502_v45 = vsel %vm501_vm1, %v497_v62, inf  ;;  %vm516_vm2 = vcmp.eq.f32.partialorder %v1312_v52, %v1391_v5  ;;  %v341_v52 = vcvt.f32.s32 %v1331_v35  ;;  %v446_v62 = vcvt.f32.s32 %v1368_v40 }
 0x240   :  { %503 = vmin.xlane.f32.xlu0 %v502_v45  ;;  %v517_v49 = vsel %vm516_vm2, %v512_v13, inf }
 0x241   :  { %518 = vmin.xlane.f32.xlu1 %v517_v49  ;;  %v342_v21 = vshll.u32 %v341_v52, 16  ;;  %v447_v52 = vshll.u32 %v446_v62, 16 }
 0x2ae   :  { %v294_v29 = vpop.xlane.xlu0 %293 }
 0x2af   :  { %v295_v42 = vcvt.f32.s32 %v294_v29  ;;  %v461_v29 = vcvt.f32.s32 %v1371_v43 }
 0x2b1   :  { %v298_v19 = vadd.s32 %v297_v37, %v295_v42  ;;  %v432_v42 = vshll.u32 %v431_v7, 16 }
 0x2b2   :  { %v309_v15 = vpop.xlane.xlu1 %308 }
 0x2b3   :  { %v310_v17 = vcvt.f32.s32 %v309_v15  ;;  %vm524_vm4 = vcmp.eq.s32.totalorder %v1170_v26, %v298_v19 }
 0x2b4   :  { %v713_v4 = vsel %vm524_vm4, 1.0, %v977_v47 }
 0x2b5   :  { %v313_v57 = vadd.s32 %v312_v36, %v310_v17  ;;  %v324_v54 = vpop.xlane.xlu0 %323  ;;  %v654_v59 = vsel %vm203_vm0, %v713_v4, 0.0  ;;  %v476_v17 = vcvt.f32.s32 %v1379_v50  ;;  %v491_v50 = vcvt.f32.s32 %v1382_v58 }
 0x2b6   :  { %v325_v56 = vcvt.f32.s32 %v324_v54  ;;  %v339_v3 = vpop.xlane.xlu1 %338 }
 0x2b7   :  { %v340_v35 = vcvt.f32.s32 %v339_v3  ;;  %vm525_vm5 = vcmp.eq.s32.totalorder %v1170_v26, %v313_v57  ;;  %v477_v44 = vshll.u32 %v476_v17, 16 }
 0x2b8   :  { %v328_v2 = vadd.s32 %v327_v10, %v325_v56  ;;  %v714_v18 = vsel %vm525_vm5, 1.0, %v977_v47  ;;  %vm920_vm6 = vmpackc.low %vm525_vm5, %vm524_vm4  ;;  %v462_v10 = vshll.u32 %v461_v29, 16 }
 0x2b9   :  { %v343_v0 = vadd.s32 %v342_v21, %v340_v35  ;;  %921 = vmatpush3.bf16.msk.msra.mxu1 %vm920_vm6, %v978_v16  ;;  %v655_v20 = vsel %vm203_vm0, %v714_v18, 0.0  ;;  %v354_v8 = vpop.xlane.xlu0 %353 }
 0x2ba   :  { %v656_v38 = vadd.f32 %v655_v20, %v654_v59  ;;  %v355_v28 = vcvt.f32.s32 %v354_v8  ;;  %v369_v11 = vpop.xlane.xlu1 %368  ;;  %922 = vmatprep.subr.bf16.mxu1 %v975_v48  ;;  %vm526_vm7 = vcmp.eq.s32.totalorder %v1170_v26, %v328_v2  ;;  %v506_v20 = vcvt.f32.s32 %v1389_v61 }
 0x2bb   :  { %v370_v1 = vcvt.f32.s32 %v369_v11  ;;  %vm527_vm8 = vcmp.eq.s32.totalorder %v1170_v26, %v343_v0  ;;  %v715_v23 = vsel %vm526_vm7, 1.0, %v977_v47 }
 0x2bc   :  { %v358_v22 = vadd.s32 %v357_v63, %v355_v28  ;;  %v716_v24 = vsel %vm527_vm8, 1.0, %v977_v47  ;;  %vm923_vm9 = vmpackc.low %vm527_vm8, %vm526_vm7  ;;  %v657_v31 = vsel %vm203_vm0, %v715_v23, 0.0  ;;  %v521_v28 = vcvt.f32.s32 %v1391_v5 }
 0x2bd   :  { %v373_v55 = vadd.s32 %v372_v30, %v370_v1  ;;  %924 = vmatpush3.bf16.msk.msra.mxu1 %vm923_vm9, %v978_v16  ;;  %v658_v32 = vadd.f32 %v657_v31, %v656_v38  ;;  %v659_v39 = vsel %vm203_vm0, %v716_v24, 0.0  ;;  %v384_v34 = vpop.xlane.xlu0 %383  ;;  %v573_v30 = vshrl.u32 %v201_v25, 7 }
 0x2be   :  { %v385_v13 = vcvt.f32.s32 %v384_v34  ;;  %v399_v45 = vpop.xlane.xlu1 %398  ;;  %925 = vmatprep.subr.bf16.mxu1 %v975_v48  ;;  %vm528_vm10 = vcmp.eq.s32.totalorder %v1170_v26, %v358_v22  ;;  %v492_v23 = vshll.u32 %v491_v50, 16  ;;  %v507_v7 = vshll.u32 %v506_v20, 16 }
 0x2bf   :  { %v660_v49 = vadd.f32 %v659_v39, %v658_v32  ;;  %v400_v6 = vcvt.f32.s32 %v399_v45  ;;  %vm529_vm11 = vcmp.eq.s32.totalorder %v1170_v26, %v373_v55  ;;  %v717_v33 = vsel %vm528_vm10, 1.0, %v977_v47 }
 0x2c0   :  { %v388_v37 = vadd.s32 %v387_v41, %v385_v13  ;;  %v718_v9 = vsel %vm529_vm11, 1.0, %v977_v47  ;;  %vm926_vm12 = vmpackc.low %vm529_vm11, %vm528_vm10  ;;  %v661_v40 = vsel %vm203_vm0, %v717_v33, 0.0  ;;  %v576_v61 = vadd.s32 1, %v573_v30 }
 0x2c1   :  { %v403_v19 = vadd.s32 %v402_v27, %v400_v6  ;;  %927 = vmatpush3.bf16.msk.msra.mxu1 %vm926_vm12, %v978_v16  ;;  %v662_v12 = vadd.f32 %v661_v40, %v660_v49  ;;  %v663_v15 = vsel %vm203_vm0, %v718_v9, 0.0  ;;  %v414_v36 = vpop.xlane.xlu0 %413  ;;  %v522_v34 = vshll.u32 %v521_v28, 16 }
 0x2c2   :  { %v415_v46 = vcvt.f32.s32 %v414_v36  ;;  %v429_v51 = vpop.xlane.xlu1 %428  ;;  %928 = vmatprep.subr.bf16.mxu1 %v975_v48  ;;  %vm530_vm13 = vcmp.eq.s32.totalorder %v1170_v26, %v388_v37  ;;  %v574_v33 = vmul.u32 16, %v573_v30  ;;  %v577_v29 = vmul.u32 16, %v576_v61 }
 0x2c3   :  { %v664_v43 = vadd.f32 %v663_v15, %v662_v12  ;;  %v430_v57 = vcvt.f32.s32 %v429_v51  ;;  %vm531_vm14 = vcmp.eq.s32.totalorder %v1170_v26, %v403_v19  ;;  %v719_v54 = vsel %vm530_vm13, 1.0, %v977_v47 }
 0x2c4   :  { %v418_v56 = vadd.s32 %v417_v60, %v415_v46  ;;  %v720_v3 = vsel %vm531_vm14, 1.0, %v977_v47  ;;  %vm929_vm15 = vmpackc.low %vm531_vm14, %vm530_vm13  ;;  %v665_v4 = vsel %vm203_vm0, %v719_v54, 0.0  ;;  %vm575_vm11 = vcmp.ge.s32.totalorder %v1170_v26, %v574_v33 }
 0x2c5   :  { %v433_v21 = vadd.s32 %v432_v42, %v430_v57  ;;  %930 = vmatpush3.bf16.msk.msra.mxu1 %vm929_vm15, %v978_v16  ;;  %v666_v53 = vadd.f32 %v665_v4, %v664_v43  ;;  %v667_v35 = vsel %vm203_vm0, %v720_v3, 0.0  ;;  %v444_v63 = vpop.xlane.xlu0 %443  ;;  %vm578_vm12 = vcmp.lt.s32.totalorder %v1170_v26, %v577_v29 }
 0x2c6   :  { %v445_v2 = vcvt.f32.s32 %v444_v63  ;;  %v459_v18 = vpop.xlane.xlu1 %458  ;;  %931 = vmatprep.subr.bf16.mxu1 %v975_v48  ;;  %vm532_vm1 = vcmp.eq.s32.totalorder %v1170_v26, %v418_v56  ;;  %vm579_vm15 = vmand %vm575_vm11, %vm578_vm12 }
 0x2c7   :  { %v668_v0 = vadd.f32 %v667_v35, %v666_v53  ;;  %v460_v59 = vcvt.f32.s32 %v459_v18  ;;  %vm533_vm2 = vcmp.eq.s32.totalorder %v1170_v26, %v433_v21  ;;  %v721_v58 = vsel %vm532_vm1, 1.0, %v977_v47 }
 0x2c8   :  { %v448_v8 = vadd.s32 %v447_v52, %v445_v2  ;;  %v722_v14 = vsel %vm533_vm2, 1.0, %v977_v47  ;;  %vm932_vm3 = vmpackc.low %vm533_vm2, %vm532_vm1  ;;  %v669_v38 = vsel %vm203_vm0, %v721_v58, 0.0  ;;  %vm692_vm1 = vcmask 24576  }
 0x2c9   :  { %v463_v11 = vadd.s32 %v462_v10, %v460_v59  ;;  %933 = vmatpush3.bf16.msk.msra.mxu1 %vm932_vm3, %v978_v16  ;;  %v670_v25 = vadd.f32 %v669_v38, %v668_v0  ;;  %v671_v41 = vsel %vm203_vm0, %v722_v14, 0.0  ;;  %v474_v1 = vpop.xlane.xlu0 %473  ;;  %v979_v10 = vmov 1.0  }
 0x2ca   :  { %v475_v27 = vcvt.f32.s32 %v474_v1  ;;  %v489_v22 = vpop.xlane.xlu1 %488  ;;  %934 = vmatprep.subr.bf16.mxu1 %v975_v48  ;;  %vm534_vm4 = vcmp.eq.s32.totalorder %v1170_v26, %v448_v8 }
 0x2cb   :  { %v672_v24 = vadd.f32 %v671_v41, %v670_v25  ;;  %v490_v31 = vcvt.f32.s32 %v489_v22  ;;  %vm535_vm5 = vcmp.eq.s32.totalorder %v1170_v26, %v463_v11  ;;  %v723_v5 = vsel %vm534_vm4, 1.0, %v977_v47 }
 0x2cc   :  { %v478_v55 = vadd.s32 %v477_v44, %v475_v27  ;;  %v724_v32 = vsel %vm535_vm5, 1.0, %v977_v47  ;;  %vm935_vm6 = vmpackc.low %vm535_vm5, %vm534_vm4  ;;  %v673_v39 = vsel %vm203_vm0, %v723_v5, 0.0 }
 0x2cd   :  { %v493_v60 = vadd.s32 %v492_v23, %v490_v31  ;;  %936 = vmatpush3.bf16.msk.msra.mxu1 %vm935_vm6, %v978_v16  ;;  %v674_v62 = vadd.f32 %v673_v39, %v672_v24  ;;  %v675_v13 = vsel %vm203_vm0, %v724_v32, 0.0  ;;  %v504_v45 = vpop.xlane.xlu0 %503 }
 0x2ce   :  { %v505_v49 = vcvt.f32.s32 %v504_v45  ;;  %v519_v6 = vpop.xlane.xlu1 %518  ;;  %937 = vmatprep.subr.bf16.mxu1 %v975_v48  ;;  %vm536_vm7 = vcmp.eq.s32.totalorder %v1170_v26, %v478_v55 }
 0x2cf   :  { %v676_v37 = vadd.f32 %v675_v13, %v674_v62  ;;  %v520_v9 = vcvt.f32.s32 %v519_v6  ;;  %vm537_vm8 = vcmp.eq.s32.totalorder %v1170_v26, %v493_v60  ;;  %v725_v40 = vsel %vm536_vm7, 1.0, %v977_v47 }
 0x2d0   :  { %v508_v42 = vadd.s32 %v507_v7, %v505_v49  ;;  %v726_v19 = vsel %vm537_vm8, 1.0, %v977_v47  ;;  %vm938_vm9 = vmpackc.low %vm537_vm8, %vm536_vm7  ;;  %v677_v12 = vsel %vm203_vm0, %v725_v40, 0.0 }
 0x2d1   :  { %v523_v15 = vadd.s32 %v522_v34, %v520_v9  ;;  %939 = vmatpush3.bf16.msk.msra.mxu1 %vm938_vm9, %v978_v16  ;;  %v678_v36 = vadd.f32 %v677_v12, %v676_v37  ;;  %v679_v52 = vsel %vm203_vm0, %v726_v19, 0.0 }
 0x2d2   :  { %vm538_vm10 = vcmp.eq.s32.totalorder %v1170_v26, %v508_v42  ;;  %940 = vmatprep.subr.bf16.mxu1 %v975_v48 }
 0x2d3   :  { %v727_v17 = vsel %vm538_vm10, 1.0, %v977_v47  ;;  %vm539_vm13 = vcmp.eq.s32.totalorder %v1170_v26, %v523_v15  ;;  %v680_v46 = vadd.f32 %v679_v52, %v678_v36 }
 0x2d4   :  { %v681_v51 = vsel %vm203_vm0, %v727_v17, 0.0  ;;  %v728_v43 = vsel %vm539_vm13, 1.0, %v977_v47  ;;  %vm941_vm14 = vmpackc.low %vm539_vm13, %vm538_vm10 }
 0x2d5   :  { %v683_v57 = vsel %vm203_vm0, %v728_v43, 0.0  ;;  %v682_v54 = vadd.f32 %v681_v51, %v680_v46  ;;  %942 = vmatpush3.bf16.msk.msra.mxu1 %vm941_vm14, %v978_v16 }
 0x2d7   :  { %v684_v48 = vadd.f32 %v683_v57, %v682_v54 }
 0x2d8   :  { %885 = vmatmul.mubr.msk.f32.vlgmr.msra.gmra.mrb[0].mxu1 %vm579_vm15, %v979_v10 }
 0x2d9   :  { %v685_v56 = vrot.slane %v684_v48, 4 }
 0x2db   :  { %v686_v3 = vadd.f32 %v685_v56, %v684_v48 }
 0x2dd   :  { %v687_v4 = vrot.slane %v686_v3, 2 }
 0x2df   :  { %v688_v50 = vadd.f32 %v687_v4, %v686_v3 }
 0x2e1   :  { %v689_v26 = vrot.slane %v688_v50, 1 }
 0x2e3   :  { %v690_v21 = vadd.f32 %v689_v26, %v688_v50 }
 0x2e5   :  { %v943_v53 = vtrunc.f32 %v690_v21 }
 0x2e7   :  { %v944_v35 = vcvt.f32.s32 %v943_v53 }
 0x2e9   :  { %693 = vst.msk [vmem:[#allocation2] sm:$0x1] %vm692_vm1, %v944_v35 }
 0x2ea   :  { %962 = shalt.err (!%p959_p4)
}
 0x2eb   :  { %s963_s5 = scalar_lea.hbm %s1504_s4, 16 }
 0x2ec   :  { %p964_p5 = scmp.ne.s32.totalorder %s1504_s4, %s963_s5  ;;  %p967_p6 = scmp.lt.u32.totalorder %s963_s5, %s1504_s4 }
 0x2ee   :  { %p969_p7 = pnand %p967_p6, %p964_p5 }
 0x2f0   :  { %972 = shalt.err (!%p969_p7)
}
 0x2f1   :  { %705 = dma.vmem_to_hbm [thread:$0]  %s703_s2, 16, %s1504_s4, [#allocation3]  }
 0x3ab   :  { %v648_v47 = vpop.f32.mrb[0].mxu1 }
 0x3ac   :  { %v652_v16 = vmul.f32 0.0625, %v648_v47  ;;  %v886_v63 = vpop.f32.mrb[1].mxu1 }
 0x3ae   :  { %653 = vst.msk [vmem:[%s1503_s3] sm:$0xff] %vm203_vm0, %v652_v16 }
 0x3af   :  { %973 = dma.done.wait [#allocation3], 16  }
 0x3b0   :  { %974 = vsyncadd [#allocation3], 4294967280 }
 0x3b1   :  { %711 = vsyncpa [#allocation3], 1 }

</bundles_post_ra>
